<compile_context>
chip_gen: v7x
topology: tpu7x:2x2x1
jax: 0.10.0
libtpu: 0.0.40
codegen_flags: <defaults>
</compile_context>

<pallas_src>
import functools

import jax
import jax.numpy as jnp
from jax.experimental import pallas as pl
from jax.experimental.pallas import tpu as pltpu


def fused_cwcnn_kernel(xk_ref, cw_ref, cb_ref, w_ref, b_ref, out_ref, *, use_mxu):
    """Fused channel-wise conv -> flatten -> linear -> log_softmax.

    xk_ref: (K, B, J)  tap slab, xk[k,b,j] = x[b, c(j), t(j)+k]   (VMEM, lane-dense)
    cw_ref: (K, 1, J)  conv weight expanded to flattened-feature axis      (VMEM)
    cb_ref: (1, J)     conv bias expanded to flattened-feature axis        (VMEM)
    w_ref:  (J, N) if use_mxu else (N, J)   classifier weight              (VMEM)
    b_ref:  (1, N)     classifier bias                                     (VMEM)
    out_ref: (B, N)    log-probabilities                                   (VMEM)
    J = n_filter * n_chan * t_out, in PyTorch's feature.view(B, -1) order.
    """
    # Conv for all filters/channels/taps at once: dense VPU multiply-adds, no
    # lane-misaligned slices, no scalar broadcasts, no long accumulation chain.
    feat = cb_ref[...] + jnp.sum(xk_ref[...] * cw_ref[...], axis=0)      # (B, J) f32

    n_classes = out_ref.shape[-1]
    if use_mxu:
        # Single K = J contraction on the MXU (instead of C*F tiny dots).
        logits = jnp.dot(feat, w_ref[...],
                         preferred_element_type=jnp.float32) + b_ref[...]
    else:
        # Sub-vreg result: skip the MXU entirely (its push->drain latency is
        # pure overhead here).  n_classes broadcast-multiplies + lane
        # reductions on the VPU/XLU; each scalar column is placed at its lane
        # via a one-hot mask (no lane-concatenate primitives needed).
        lane = jax.lax.broadcasted_iota(jnp.int32, (1, n_classes), 1)
        logits = b_ref[...]
        for n in range(n_classes):
            col = jnp.sum(feat * w_ref[n], axis=-1, keepdims=True)       # (B, 1)
            logits = logits + col * (lane == n).astype(jnp.float32)      # (B, N)

    m = jnp.max(logits, axis=-1, keepdims=True)
    shifted = logits - m
    out_ref[...] = shifted - jnp.log(
        jnp.sum(jnp.exp(shifted), axis=-1, keepdims=True))


@jax.jit
def channelwise_cnn_forward(x, conv_w, conv_b, clf_w, clf_b):
    """Forward pass equivalent to ChannelWiseCNN.forward (eval mode).

    x: (B, n_chan, time_step) or (B, 1, n_chan, time_step) float32
    conv_w: (n_filter, kernel_size), conv_b: (n_filter,)
    clf_w: (n_filter*n_chan*t_out, n_classes)  (transposed nn.Linear layout)
    clf_b: (n_classes,)
    """
    if x.ndim == 4:                      # NCHW input with in_channels == 1
        x = x[:, 0]
    x = x.astype(jnp.float32)
    B, C, T = x.shape
    F_, K = conv_w.shape
    t_out = T - (K - 1)
    J = F_ * C * t_out
    n_classes = clf_b.shape[0]

    # Layout plumbing (tiny tensors, fused by XLA into the kernel's prologue):
    #   taps[k, b, c, t] = x[b, c, t + k]          (valid cross-correlation)
    #   xk[k, b, f*C*t_out + c*t_out + t] = taps[k, b, c, t]
    # i.e. every tap window is replicated across the filter axis and flattened
    # in PyTorch's feature.view(B, -1) order, so the kernel never does a
    # lane-misaligned slice or an in-kernel reshape.
    taps = jnp.stack([x[:, :, k:k + t_out] for k in range(K)], axis=0)   # (K,B,C,t_out)
    xk = jnp.broadcast_to(taps.reshape(K, B, 1, C * t_out),
                          (K, B, F_, C * t_out)).reshape(K, B, J)
    # Conv weight/bias expanded along the same flattened-feature axis:
    # lane j uses filter f = j // (C*t_out).
    cw_lane = jnp.repeat(conv_w.astype(jnp.float32).T, C * t_out,
                         axis=-1).reshape(K, 1, J)
    cb_lane = jnp.repeat(conv_b.astype(jnp.float32), C * t_out).reshape(1, J)

    # Tiny class counts: VPU/XLU contraction beats MXU push/drain (esp. on
    # v5e's sequentially drained MRF).  Larger heads: one big MXU dot.
    use_mxu = n_classes > 16
    w_arg = clf_w.astype(jnp.float32) if use_mxu else clf_w.astype(jnp.float32).T
    b_arg = clf_b.astype(jnp.float32).reshape(1, n_classes)

    kernel = functools.partial(fused_cwcnn_kernel, use_mxu=use_mxu)

    # TODO(synk): dropout_0 omitted - module is evaluated in inference mode,
    # where nn.Dropout is the identity.
    # Note: gridless call -> runs on a single TensorCore.  If batch grows
    # beyond toy sizes, add a grid over B (sublane-tiled BlockSpecs,
    # dimension_semantics=("parallel",)) so v7x's two TCs split the batch and
    # DMA overlaps compute; at B=2 a grid would only add per-step overhead.
    return pl.pallas_call(
        kernel,
        out_shape=jax.ShapeDtypeStruct((B, n_classes), jnp.float32),
        in_specs=[
            pl.BlockSpec(memory_space=pltpu.MemorySpace.VMEM),   # xk (K, B, J)
            pl.BlockSpec(memory_space=pltpu.MemorySpace.VMEM),   # cw_lane
            pl.BlockSpec(memory_space=pltpu.MemorySpace.VMEM),   # cb_lane
            pl.BlockSpec(memory_space=pltpu.MemorySpace.VMEM),   # classifier W
            pl.BlockSpec(memory_space=pltpu.MemorySpace.VMEM),   # classifier b
        ],
        out_specs=pl.BlockSpec(memory_space=pltpu.MemorySpace.VMEM),
    )(xk, cw_lane, cb_lane, w_arg, b_arg)


def _reference_forward(x, conv_w, conv_b, clf_w, clf_b):
    """Pure-JAX reference for a correctness sanity check (full f32 precision)."""
    if x.ndim == 4:
        x = x[:, 0]
    B, C, T = x.shape
    F_, K = conv_w.shape
    t_out = T - (K - 1)
    hi = jax.lax.Precision.HIGHEST
    # conv: feature[b, f, c, t] = sum_k x[b, c, t+k] * w[f, k] + b[f]
    patches = jnp.stack([x[:, :, k:k + t_out] for k in range(K)], axis=-1)
    feat = jnp.einsum("bctk,fk->bfct", patches, conv_w,
                      precision=hi) + conv_b[None, :, None, None]
    feat_flat = feat.reshape(B, -1)
    logits = jnp.matmul(feat_flat, clf_w, precision=hi) + clf_b[None, :]
    return jax.nn.log_softmax(logits, axis=-1)


if __name__ == "__main__":
    # Module hyper-parameters (small, consistent with the PyTorch module).
    n_chan, time_step, n_classes = 4, 16, 3
    n_filter, kernel_size, drop_p0 = 8, 5, 0.5
    batch = 2
    t_out = time_step - (kernel_size - 1)
    f_total = n_filter * n_chan * t_out

    key = jax.random.PRNGKey(0)
    kx, kcw, kcb, kww, kwb = jax.random.split(key, 5)

    # Deterministic synthetic parameters (shapes from the module __init__).
    x = jax.random.normal(kx, (batch, n_chan, time_step), dtype=jnp.float32)
    conv_w = 0.1 * jax.random.normal(kcw, (n_filter, kernel_size), dtype=jnp.float32)
    conv_b = 0.1 * jax.random.normal(kcb, (n_filter,), dtype=jnp.float32)
    # PyTorch nn.Linear stores (n_classes, f_total); we keep the transposed layout.
    clf_w = 0.05 * jax.random.normal(kww, (f_total, n_classes), dtype=jnp.float32)
    clf_b = 0.05 * jax.random.normal(kwb, (n_classes,), dtype=jnp.float32)

    out = channelwise_cnn_forward(x, conv_w, conv_b, clf_w, clf_b)
    out = jax.block_until_ready(out)

    ref = _reference_forward(x, conv_w, conv_b, clf_w, clf_b)
    assert out.shape == (batch, n_classes)
    assert jnp.allclose(out, ref, atol=1e-4, rtol=1e-4), "mismatch vs reference"

    print("KERNEL_OK")
</pallas_src>

<mosaic_0001>
module attributes {stable_mosaic.version = 11 : i64} {
  func.func @fused_cwcnn_kernel(%arg0: memref<5x2x384xf32, #tpu.memory_space<vmem>>, %arg1: memref<5x1x384xf32, #tpu.memory_space<vmem>>, %arg2: memref<1x384xf32, #tpu.memory_space<vmem>>, %arg3: memref<3x384xf32, #tpu.memory_space<vmem>>, %arg4: memref<1x3xf32, #tpu.memory_space<vmem>>, %arg5: memref<2x3xf32, #tpu.memory_space<vmem>>) attributes {dimension_semantics = [], scalar_prefetch = 0 : i64, scratch_operands = 0 : i64, tpu.core_type = #tpu.core_type<tc>} {
    %c0 = arith.constant 0 : index
    %c0_0 = arith.constant 0 : index
    %0 = vector.load %arg2[%c0, %c0_0] : memref<1x384xf32, #tpu.memory_space<vmem>>, vector<1x384xf32>
    %c0_1 = arith.constant 0 : index
    %c0_2 = arith.constant 0 : index
    %c0_3 = arith.constant 0 : index
    %1 = vector.load %arg0[%c0_1, %c0_2, %c0_3] : memref<5x2x384xf32, #tpu.memory_space<vmem>>, vector<5x2x384xf32>
    %c0_4 = arith.constant 0 : index
    %c0_5 = arith.constant 0 : index
    %c0_6 = arith.constant 0 : index
    %2 = vector.load %arg1[%c0_4, %c0_5, %c0_6] : memref<5x1x384xf32, #tpu.memory_space<vmem>>, vector<5x1x384xf32>
    %3 = vector.broadcast %2 : vector<5x1x384xf32> to vector<5x2x384xf32>
    %4 = arith.mulf %1, %3 : vector<5x2x384xf32>
    %cst = arith.constant dense<0.000000e+00> : vector<2x384xf32>
    %5 = vector.multi_reduction <add>, %4, %cst [0] : vector<5x2x384xf32> to vector<2x384xf32>
    %6 = vector.broadcast %0 : vector<1x384xf32> to vector<2x384xf32>
    %7 = arith.addf %6, %5 : vector<2x384xf32>
    %8 = tpu.iota {dimensions = array<i32: 1>} : vector<1x3xi32>
    %c0_7 = arith.constant 0 : index
    %c0_8 = arith.constant 0 : index
    %9 = vector.load %arg4[%c0_7, %c0_8] : memref<1x3xf32, #tpu.memory_space<vmem>>, vector<1x3xf32>
    %c0_9 = arith.constant 0 : index
    %c0_10 = arith.constant 0 : index
    %10 = vector.load %arg3[%c0_9, %c0_10] : memref<3x384xf32, #tpu.memory_space<vmem>>, vector<1x384xf32>
    %11 = vector.shape_cast %10 : vector<1x384xf32> to vector<384xf32>
    %12 = vector.shape_cast %11 : vector<384xf32> to vector<1x384xf32>
    %13 = vector.broadcast %12 : vector<1x384xf32> to vector<2x384xf32>
    %14 = arith.mulf %7, %13 : vector<2x384xf32>
    %cst_11 = arith.constant dense<0.000000e+00> : vector<2xf32>
    %15 = vector.multi_reduction <add>, %14, %cst_11 [1] : vector<2x384xf32> to vector<2xf32>
    %16 = vector.shape_cast %15 : vector<2xf32> to vector<2x1xf32>
    %c0_i32 = arith.constant 0 : i32
    %17 = vector.broadcast %c0_i32 : i32 to vector<1x3xi32>
    %18 = arith.cmpi eq, %8, %17 : vector<1x3xi32>
    %19 = arith.extui %18 : vector<1x3xi1> to vector<1x3xi32>
    %20 = arith.sitofp %19 : vector<1x3xi32> to vector<1x3xf32>
    %21 = vector.broadcast %16 : vector<2x1xf32> to vector<2x3xf32>
    %22 = vector.broadcast %20 : vector<1x3xf32> to vector<2x3xf32>
    %23 = arith.mulf %21, %22 : vector<2x3xf32>
    %24 = vector.broadcast %9 : vector<1x3xf32> to vector<2x3xf32>
    %25 = arith.addf %24, %23 : vector<2x3xf32>
    %c1 = arith.constant 1 : index
    %c0_12 = arith.constant 0 : index
    %26 = vector.load %arg3[%c1, %c0_12] : memref<3x384xf32, #tpu.memory_space<vmem>>, vector<1x384xf32>
    %27 = vector.shape_cast %26 : vector<1x384xf32> to vector<384xf32>
    %28 = vector.shape_cast %27 : vector<384xf32> to vector<1x384xf32>
    %29 = vector.broadcast %28 : vector<1x384xf32> to vector<2x384xf32>
    %30 = arith.mulf %7, %29 : vector<2x384xf32>
    %cst_13 = arith.constant dense<0.000000e+00> : vector<2xf32>
    %31 = vector.multi_reduction <add>, %30, %cst_13 [1] : vector<2x384xf32> to vector<2xf32>
    %32 = vector.shape_cast %31 : vector<2xf32> to vector<2x1xf32>
    %c1_i32 = arith.constant 1 : i32
    %33 = vector.broadcast %c1_i32 : i32 to vector<1x3xi32>
    %34 = arith.cmpi eq, %8, %33 : vector<1x3xi32>
    %35 = arith.extui %34 : vector<1x3xi1> to vector<1x3xi32>
    %36 = arith.sitofp %35 : vector<1x3xi32> to vector<1x3xf32>
    %37 = vector.broadcast %32 : vector<2x1xf32> to vector<2x3xf32>
    %38 = vector.broadcast %36 : vector<1x3xf32> to vector<2x3xf32>
    %39 = arith.mulf %37, %38 : vector<2x3xf32>
    %40 = arith.addf %25, %39 : vector<2x3xf32>
    %c2 = arith.constant 2 : index
    %c0_14 = arith.constant 0 : index
    %41 = vector.load %arg3[%c2, %c0_14] : memref<3x384xf32, #tpu.memory_space<vmem>>, vector<1x384xf32>
    %42 = vector.shape_cast %41 : vector<1x384xf32> to vector<384xf32>
    %43 = vector.shape_cast %42 : vector<384xf32> to vector<1x384xf32>
    %44 = vector.broadcast %43 : vector<1x384xf32> to vector<2x384xf32>
    %45 = arith.mulf %7, %44 : vector<2x384xf32>
    %cst_15 = arith.constant dense<0.000000e+00> : vector<2xf32>
    %46 = vector.multi_reduction <add>, %45, %cst_15 [1] : vector<2x384xf32> to vector<2xf32>
    %47 = vector.shape_cast %46 : vector<2xf32> to vector<2x1xf32>
    %c2_i32 = arith.constant 2 : i32
    %48 = vector.broadcast %c2_i32 : i32 to vector<1x3xi32>
    %49 = arith.cmpi eq, %8, %48 : vector<1x3xi32>
    %50 = arith.extui %49 : vector<1x3xi1> to vector<1x3xi32>
    %51 = arith.sitofp %50 : vector<1x3xi32> to vector<1x3xf32>
    %52 = vector.broadcast %47 : vector<2x1xf32> to vector<2x3xf32>
    %53 = vector.broadcast %51 : vector<1x3xf32> to vector<2x3xf32>
    %54 = arith.mulf %52, %53 : vector<2x3xf32>
    %55 = arith.addf %40, %54 : vector<2x3xf32>
    %cst_16 = arith.constant dense<0xFF800000> : vector<2xf32>
    %56 = vector.multi_reduction <maximumf>, %55, %cst_16 [1] : vector<2x3xf32> to vector<2xf32>
    %57 = vector.shape_cast %56 : vector<2xf32> to vector<2x1xf32>
    %58 = vector.broadcast %57 : vector<2x1xf32> to vector<2x3xf32>
    %59 = arith.subf %55, %58 : vector<2x3xf32>
    %60 = math.exp %59 : vector<2x3xf32>
    %cst_17 = arith.constant dense<0.000000e+00> : vector<2xf32>
    %61 = vector.multi_reduction <add>, %60, %cst_17 [1] : vector<2x3xf32> to vector<2xf32>
    %62 = vector.shape_cast %61 : vector<2xf32> to vector<2x1xf32>
    %63 = math.log %62 : vector<2x1xf32>
    %64 = vector.broadcast %63 : vector<2x1xf32> to vector<2x3xf32>
    %65 = arith.subf %59, %64 : vector<2x3xf32>
    %c0_18 = arith.constant 0 : index
    %c0_19 = arith.constant 0 : index
    %66 = vector.load %arg5[%c0_18, %c0_19] : memref<2x3xf32, #tpu.memory_space<vmem>>, vector<2x3xf32>
    tpu.vector_store %arg5[%c0_18, %c0_19], %65 {strides = array<i32>} : memref<2x3xf32, #tpu.memory_space<vmem>>, vector<2x3xf32>,
    return
  }
}

</mosaic_0001>

<bundles_post_ra>
// kernel: channelwise_cnn_forward.1
= control target key start
LH: loop header
LB: loop body
LE: loop exit
PB: predicated region body
PF: predicated region fallthrough
CT: control target
= control target key end

     0   :  { %v37_v0 = vlaneseq  ;;  %v506_v13 = vmov 1983009808   ;;  %s658_s0 = inlined_call_operand.vmem [shape: f32[5,2,384], index: 0, kind: input, shape index: {}]   ;;  %s659_s1 = inlined_call_operand.vmem [shape: f32[5,1,384], index: 1, kind: input, shape index: {}]   ;;  %s660_s2 = inlined_call_operand.vmem [shape: f32[1,384], index: 2, kind: input, shape index: {}]   ;;  %s661_s3 = inlined_call_operand.vmem [shape: f32[3,384], index: 3, kind: input, shape index: {}]   ;;  %s662_s4 = inlined_call_operand.vmem [shape: f32[1,3], index: 4, kind: input, shape index: {}]   ;;  %s663_s5 = inlined_call_operand.hbm [shape: f32[2,3], index: 5, kind: output, shape index: {}]  }
   0x1   :  { %v27_v2 = vld [vmem:[%s659_s1] sm:$0x7]  ;;  %v28_v3 = vld [vmem:[%s659_s1 + $0x3] sm:$0x7]  ;;  %v29_v4 = vld [vmem:[%s659_s1 + $0x6] sm:$0x7]  ;;  %v99_v14 = vunpack.c.l.s4 %v506_v13 }
   0x2   :  { %v38_v1 = vshrl.u32 %v37_v0, 7  ;;  %v30_v7 = vld [vmem:[%s659_s1 + $0x9] sm:$0x7]  ;;  %v31_v9 = vld [vmem:[%s659_s1 + $0xc] sm:$0x7] }
   0x4   :  { %v549_v5 = vsub.s32 0, %v38_v1  ;;  %v551_v6 = vsub.s32 1, %v38_v1  ;;  %v556_v8 = vsub.s32 2, %v38_v1 }
   0x6   :  { %v40_v10 = vrot.slane %v27_v2, %v549_v5  ;;  %v44_v11 = vrot.slane %v27_v2, %v551_v6  ;;  %v52_v12 = vrot.slane %v28_v3, %v549_v5 }
   0x7   :  { %10 = vsyncpa [#allocation3], 0  ;;  %v56_v15 = vrot.slane %v28_v3, %v551_v6  ;;  %v64_v16 = vrot.slane %v29_v4, %v549_v5  ;;  %v68_v17 = vrot.slane %v29_v4, %v551_v6  ;;  %v76_v18 = vrot.slane %v30_v7, %v549_v5  ;;  %v22_v38 = vld [vmem:[%s658_s0] sm:$0x3f]  ;;  %v23_v39 = vld [vmem:[%s658_s0 + $0x6] sm:$0x3f] }
   0x8   :  { %v80_v19 = vrot.slane %v30_v7, %v551_v6  ;;  %v48_v20 = vrot.slane %v27_v2, %v556_v8  ;;  %v88_v21 = vrot.slane %v31_v9, %v549_v5  ;;  %v92_v22 = vrot.slane %v31_v9, %v551_v6  ;;  %v24_v44 = vld [vmem:[%s658_s0 + $0xc] sm:$0x3f]  ;;  %v25_v45 = vld [vmem:[%s658_s0 + $0x12] sm:$0x3f]  ;;  %v26_v50 = vld [vmem:[%s658_s0 + $0x18] sm:$0x3f] }
   0x9   :  { %v60_v23 = vrot.slane %v28_v3, %v556_v8  ;;  %v97_v24 = vcombine.low %v40_v10, %v44_v11  ;;  %v100_v25 = vunpack.c.0.s8 %v99_v14  ;;  %v113_v26 = vcombine.low %v52_v12, %v56_v15 }
   0xa   :  { %v72_v27 = vrot.slane %v29_v4, %v556_v8  ;;  %v84_v28 = vrot.slane %v30_v7, %v556_v8  ;;  %v129_v29 = vcombine.low %v64_v16, %v68_v17  ;;  %v145_v30 = vcombine.low %v76_v18, %v80_v19  ;;  %v21_v7 = vld [vmem:[%s660_s2] sm:$0x7] }
   0xb   :  { %v96_v31 = vrot.slane %v31_v9, %v556_v8  ;;  %v103_v32 = vsub.s32 %v100_v25, %v38_v1  ;;  %v161_v33 = vcombine.low %v88_v21, %v92_v22  ;;  %vm287_vm0 = vcmask 1041408  }
   0xc   :  { %vm441_vm4 = vcmask 17408  }
   0xd   :  { %v104_v34 = vrot.slane %v97_v24, %v103_v32  ;;  %v111_v35 = vrot.slane %v48_v20, %v103_v32  ;;  %v120_v36 = vrot.slane %v113_v26, %v103_v32  ;;  %v127_v37 = vrot.slane %v60_v23, %v103_v32 }
   0xe   :  { %v136_v40 = vrot.slane %v129_v29, %v103_v32  ;;  %v143_v41 = vrot.slane %v72_v27, %v103_v32  ;;  %v152_v42 = vrot.slane %v145_v30, %v103_v32  ;;  %v159_v43 = vrot.slane %v84_v28, %v103_v32  ;;  %v337_v29 = vld [vmem:[%s661_s3] ss:$4 sm:$0x7] }
   0xf   :  { %v112_v46 = vcombine.low %v104_v34, %v111_v35  ;;  %v128_v47 = vcombine.low %v120_v36, %v127_v37  ;;  %v168_v48 = vrot.slane %v161_v33, %v103_v32  ;;  %v175_v49 = vrot.slane %v96_v31, %v103_v32  ;;  %v471_v35 = vld [vmem:[%s661_s3 + $0x1] ss:$4 sm:$0x7] }
  0x10   :  { %v144_v51 = vcombine.low %v136_v40, %v143_v41  ;;  %v160_v52 = vcombine.low %v152_v42, %v159_v43  ;;  %v319_v24 = vrot.slane %v21_v7, %v549_v5  ;;  %v473_v40 = vld [vmem:[%s661_s3 + $0x2] ss:$4 sm:$0x7]  ;;  %v323_v43 = vrot.slane %v21_v7, %v551_v6 }
  0x11   :  { %v176_v53 = vcombine.low %v168_v48, %v175_v49  ;;  %v182_v54 = vmul.f32 %v112_v46, %v22_v38  ;;  %v183_v55 = vmul.f32 %v128_v47, %v23_v39  ;;  %v342_v46 = vrot.slane %v337_v29, %v549_v5 }
  0x12   :  { %v184_v56 = vmul.f32 %v144_v51, %v24_v44  ;;  %v185_v57 = vmul.f32 %v160_v52, %v25_v45  ;;  %v381_v47 = vrot.slane %v471_v35, %v549_v5  ;;  %v414_v51 = vrot.slane %v473_v40, %v549_v5 }
  0x13   :  { %v186_v58 = vmul.f32 %v176_v53, %v26_v50  ;;  %v192_v59 = vcombine.high %v182_v54, %v182_v54  ;;  %v199_v60 = vrot.slane %v182_v54, %v103_v32  ;;  %v208_v61 = vcombine.high %v183_v55, %v183_v55 }
  0x14   :  { %v215_v62 = vrot.slane %v183_v55, %v103_v32  ;;  %v224_v63 = vcombine.high %v184_v56, %v184_v56  ;;  %v231_v1 = vrot.slane %v184_v56, %v103_v32  ;;  %v240_v3 = vcombine.high %v185_v57, %v185_v57 }
  0x15   :  { %v207_v2 = vcombine.high %v199_v60, %v199_v60  ;;  %v247_v4 = vrot.slane %v185_v57, %v103_v32  ;;  %v206_v9 = vrot.slane %v192_v59, %v103_v32  ;;  %v222_v10 = vrot.slane %v208_v61, %v103_v32 }
  0x16   :  { %v223_v11 = vcombine.high %v215_v62, %v215_v62  ;;  %v239_v12 = vcombine.high %v231_v1, %v231_v1  ;;  %v238_v13 = vrot.slane %v224_v63, %v103_v32  ;;  %v256_v14 = vcombine.high %v186_v58, %v186_v58 }
  0x17   :  { %v263_v15 = vrot.slane %v186_v58, %v103_v32  ;;  %v288_v16 = vsel %vm287_vm0, %v199_v60, 0.0  ;;  %v255_v17 = vcombine.high %v247_v4, %v247_v4  ;;  %v289_v18 = vsel %vm287_vm0, %v215_v62, 0.0 }
  0x18   :  { %v291_v19 = vsel %vm287_vm0, %v231_v1, 0.0  ;;  %v297_v20 = vsel %vm287_vm0, %v207_v2, 0.0  ;;  %v254_v21 = vrot.slane %v240_v3, %v103_v32  ;;  %v290_v22 = vadd.f32 %v289_v18, %v288_v16 }
  0x19   :  { %v293_v23 = vsel %vm287_vm0, %v247_v4, 0.0  ;;  %v271_v25 = vcombine.high %v263_v15, %v263_v15  ;;  %v298_v26 = vsel %vm287_vm0, %v223_v11, 0.0  ;;  %v300_v27 = vsel %vm287_vm0, %v239_v12, 0.0 }
  0x1a   :  { %v306_v28 = vsel %vm287_vm0, %v206_v9, 0.0  ;;  %v270_v30 = vrot.slane %v256_v14, %v103_v32  ;;  %v292_v31 = vadd.f32 %v291_v19, %v290_v22  ;;  %v299_v33 = vadd.f32 %v298_v26, %v297_v20 }
  0x1b   :  { %v307_v34 = vsel %vm287_vm0, %v222_v10, 0.0  ;;  %v295_v36 = vsel %vm287_vm0, %v263_v15, 0.0  ;;  %v302_v37 = vsel %vm287_vm0, %v255_v17, 0.0  ;;  %v309_v39 = vsel %vm287_vm0, %v238_v13, 0.0 }
  0x1c   :  { %v308_v38 = vadd.f32 %v307_v34, %v306_v28  ;;  %v294_v32 = vadd.f32 %v293_v23, %v292_v31  ;;  %v301_v41 = vadd.f32 %v300_v27, %v299_v33  ;;  %v311_v42 = vsel %vm287_vm0, %v254_v21, 0.0  ;;  %v470_v31 = vld [vmem:[%s662_s4] ss:$0 sm:$0xff]  ;;  %s508_s4 = smov [#allocation2]  }
  0x1d   :  { %v304_v44 = vsel %vm287_vm0, %v271_v25, 0.0  ;;  %v313_v50 = vsel %vm287_vm0, %v270_v30, 0.0  ;;  %v327_v53 = vrot.slane %v21_v7, %v556_v8  ;;  %v346_v54 = vrot.slane %v337_v29, %v551_v6  ;;  %s461_s19 = sshll.u32 %s508_s4, 4  ;;  %s462_s19 = int_to_ptr.vmem [resolvable:$true] %s461_s19 }
  0x1e   :  { %v310_v45 = vadd.f32 %v309_v39, %v308_v38  ;;  %v296_v48 = vadd.f32 %v295_v36, %v294_v32  ;;  %v303_v49 = vadd.f32 %v302_v37, %v301_v41  ;;  %v350_v57 = vrot.slane %v337_v29, %v556_v8  ;;  %s482_s20 = scalar_lea.vmem %s462_s19, 32  ;;  %p487_p1 = scmp.lt.s32.totalorder %s462_s19, %s462_s19 }
  0x1f   :  { %v385_v58 = vrot.slane %v471_v35, %v551_v6  ;;  %v389_v60 = vrot.slane %v471_v35, %v556_v8  ;;  %v418_v61 = vrot.slane %v473_v40, %v551_v6  ;;  %v422_v62 = vrot.slane %v473_v40, %v556_v8  ;;  %p483_p0 = scmp.ne.s32.totalorder %s462_s19, %s482_s20  ;;  %p488_p2 = scmp.lt.s32.totalorder %s482_s20, %s482_s20 }
  0x20   :  { %v312_v52 = vadd.f32 %v311_v42, %v310_v45  ;;  %v305_v55 = vadd.f32 %v304_v44, %v303_v49  ;;  %v331_v56 = vadd.f32 %v319_v24, %v296_v48  ;;  %v335_v26 = vand.u32 127, %v37_v0 }
  0x21   :  { %v507_v27 = vmov 0.0   ;;  %p489_p3 = por %p488_p2, %p487_p1 }
  0x22   :  { %v314_v59 = vadd.f32 %v313_v50, %v312_v52  ;;  %v332_v63 = vadd.f32 %v323_v43, %v305_v55  ;;  %v354_v5 = vmul.f32 %v342_v46, %v331_v56  ;;  %v393_v1 = vmul.f32 %v381_v47, %v331_v56 }
  0x23   :  { %v426_v2 = vmul.f32 %v414_v51, %v331_v56  ;;  %vm364_vm1 = vcmp.eq.s32.totalorder %v335_v26, 0  ;;  %vm403_vm2 = vcmp.eq.s32.totalorder %v335_v26, 1  ;;  %vm436_vm3 = vcmp.eq.s32.totalorder %v335_v26, 2  ;;  %p490_p4 = pnand %p489_p3, %p483_p0 }
  0x24   :  { %v333_v3 = vadd.f32 %v327_v53, %v314_v59  ;;  %v355_v4 = vmul.f32 %v346_v54, %v332_v63  ;;  %v357_v7 = vsel %vm287_vm0, %v354_v5, 0.0  ;;  %v394_v9 = vmul.f32 %v385_v58, %v332_v63 }
  0x25   :  { %v396_v10 = vsel %vm287_vm0, %v393_v1, 0.0  ;;  %v427_v13 = vmul.f32 %v418_v61, %v332_v63  ;;  %v429_v8 = vsel %vm287_vm0, %v426_v2, 0.0  ;;  %v469_v28 = vsel %vm364_vm1, 1.0, %v507_v27 }
  0x26   :  { %v356_v11 = vmul.f32 %v350_v57, %v333_v3  ;;  %v395_v12 = vmul.f32 %v389_v60, %v333_v3  ;;  %v428_v14 = vmul.f32 %v422_v62, %v333_v3  ;;  %v358_v15 = vsel %vm287_vm0, %v355_v4, 0.0 }
  0x27   :  { %v397_v6 = vsel %vm287_vm0, %v394_v9, 0.0  ;;  %v359_v16 = vadd.f32 %v358_v15, %v357_v7  ;;  %v430_v20 = vsel %vm287_vm0, %v427_v13, 0.0  ;;  %v472_v33 = vsel %vm403_vm2, 1.0, %v507_v27 }
  0x28   :  { %v360_v17 = vsel %vm287_vm0, %v356_v11, 0.0  ;;  %v398_v18 = vadd.f32 %v397_v6, %v396_v10  ;;  %v399_v19 = vsel %vm287_vm0, %v395_v12, 0.0  ;;  %v432_v21 = vsel %vm287_vm0, %v428_v14, 0.0 }
  0x29   :  { %v361_v22 = vadd.f32 %v360_v17, %v359_v16  ;;  %v431_v23 = vadd.f32 %v430_v20, %v429_v8  ;;  %v474_v34 = vsel %vm436_vm3, 1.0, %v507_v27 }
  0x2a   :  { %v400_v24 = vadd.f32 %v399_v19, %v398_v18 }
  0x2b   :  { %362 = vadd.xlane.f32.xlu0 %v361_v22  ;;  %v433_v25 = vadd.f32 %v432_v21, %v431_v23 }
  0x2d   :  { %434 = vadd.xlane.f32.xlu1 %v433_v25 }
  0x2f   :  { %401 = vadd.xlane.f32.xlu0 %v400_v24 }
  0xb8   :  { %v363_v29 = vpop.xlane.xlu0 %362 }
  0xb9   :  { %v367_v30 = vmul.f32 %v469_v28, %v363_v29 }
  0xba   :  { %v435_v35 = vpop.xlane.xlu1 %434 }
  0xbb   :  { %v374_v37 = vadd.f32 %v470_v31, %v367_v30  ;;  %v439_v39 = vmul.f32 %v474_v34, %v435_v35 }
  0xbc   :  { %v402_v36 = vpop.xlane.xlu0 %401 }
  0xbd   :  { %v406_v38 = vmul.f32 %v472_v33, %v402_v36 }
  0xbf   :  { %v407_v40 = vadd.f32 %v406_v38, %v374_v37 }
  0xc1   :  { %v440_v0 = vadd.f32 %v439_v39, %v407_v40 }
  0xc3   :  { %v442_v32 = vsel %vm441_vm4, %v440_v0, -inf }
  0xc4   :  { %443 = vmax.xlane.f32.xlu1 %v442_v32 }
 0x151   :  { %v444_v41 = vpop.xlane.xlu1 %443 }
 0x152   :  { %v445_v42 = vsub.f32 %v440_v0, %v444_v41 }
 0x154   :  { %v446_v43 = vmul.f32 1.442695, %v445_v42 }
 0x156   :  { %478 = vpow2.f32 %v446_v43 }
 0x160   :  { %v479_v44 = vpop.eup %478 }
 0x161   :  { %v448_v45 = vsel %vm441_vm4, %v479_v44, 0.0 }
 0x162   :  { %449 = vadd.xlane.f32.xlu0 %v448_v45 }
 0x1ef   :  { %v450_v46 = vpop.xlane.xlu0 %449 }
 0x1f0   :  { %480 = vlog2.f32 %v450_v46 }
 0x1fa   :  { %v481_v47 = vpop.eup %480 }
 0x1fb   :  { %v452_v48 = vmul.f32 0.6931472, %v481_v47 }
 0x1fd   :  { %v453_v49 = vsub.f32 %v445_v42, %v452_v48 }
 0x1ff   :  { %454 = vst.msk [vmem:[#allocation2] sm:$0x3] %vm441_vm4, %v453_v49 }
 0x200   :  { %493 = shalt.err (!%p490_p4)
}
 0x201   :  { %s494_s23 = scalar_lea.hbm %s663_s5, 32 }
 0x202   :  { %p495_p5 = scmp.ne.s32.totalorder %s663_s5, %s494_s23  ;;  %p498_p6 = scmp.lt.u32.totalorder %s494_s23, %s663_s5 }
 0x204   :  { %p500_p7 = pnand %p498_p6, %p495_p5 }
 0x206   :  { %503 = shalt.err (!%p500_p7)
}
 0x207   :  { %464 = dma.vmem_to_hbm [thread:$0]  %s462_s19, 32, %s663_s5, [#allocation3]  }
 0x208   :  { %504 = dma.done.wait [#allocation3], 32  }
 0x209   :  { %505 = vsyncadd [#allocation3], 4294967264 }
 0x20a   :  { %468 = vsyncpa [#allocation3], 1 }

</bundles_post_ra>
